<compile_context>
chip_gen: v7x
topology: tpu7x:2x2x1
jax: 0.10.0
libtpu: 0.0.40
codegen_flags: <defaults>
</compile_context>

<pallas_src>
import functools

import jax
import jax.numpy as jnp
from jax.experimental import pallas as pl
from jax.experimental.pallas import tpu as pltpu

PACK = 8  # batch rows packed per reshaped row (8 * 15 = 120 lanes per sublane)


def _round_up(n, m):
    return -(-n // m) * m


def regression_net_kernel(x_ref, w_ref, b_ref, o_ref):
    # x_ref: [TBr, PACK*F]   PACK batch rows flattened along lanes per sublane
    # w_ref: [PACK*F, PACK]  block-diagonal copies of the folded weight vector
    # b_ref: [1, PACK]       folded bias (broadcast over sublanes)
    # o_ref: [TBr, PACK]     PACK outputs per sublane (batch row PACK*r+i -> o[r, i])
    y = jnp.dot(x_ref[...], w_ref[...], preferred_element_type=jnp.float32)
    o_ref[...] = (y + b_ref[...]).astype(o_ref.dtype)


@functools.partial(jax.jit, static_argnames=("block_rows",))
def regression_net(x, params, *, block_rows=8192):
    """Forward pass of RegressionNet. x: [B, F] float32 -> [B, 1] float32."""
    w1, b1, w2, b2, w3, b3 = params
    B, F = x.shape

    # ---- Fold the 3 Linear layers into one affine map (exact: no nonlinearity).
    w_eff = (w1 @ w2 @ w3).reshape(F)               # [F]
    b_eff = ((b1 @ w2 + b2) @ w3 + b3).reshape(())  # scalar

    # Block-diagonal weight: W_block[i*F + c, i] = w_eff[c], zeros elsewhere.
    eye = jnp.eye(PACK, dtype=w_eff.dtype)
    w_block = jnp.einsum("ij,c->icj", eye, w_eff).reshape(PACK * F, PACK)
    b_row = jnp.full((1, PACK), b_eff, dtype=jnp.float32)

    # ---- Pack PACK batch rows per sublane. Pad only to a multiple of PACK
    # (static check; usually 0 rows) so the reshape is a free row-major bitcast.
    rows = -(-B // PACK)                            # ceil(B / PACK) packed rows
    if rows * PACK != B:
        x = jnp.pad(x, ((0, rows * PACK - B), (0, 0)))
    x_r = x.reshape(rows, PACK * F)

    # Tile size: multiple of 8 sublanes, <= block_rows, and capped at ~rows/2 so
    # the grid has >= 2 steps for v7x megacore sharding. Ragged last block is
    # handled by Pallas (OOB packed rows never reach the returned slice).
    if rows <= 8:
        tbr = rows                                  # full-extent (tiny-batch) block
    else:
        tbr = min(max(block_rows // 8, 1) * 8,
                  _round_up(-(-rows // 2), 8))
    grid = pl.cdiv(rows, tbr)

    bytes_accessed = (rows * (PACK * F + PACK) + PACK * F * PACK + PACK) * 4

    out = pl.pallas_call(
        regression_net_kernel,
        out_shape=jax.ShapeDtypeStruct((rows, PACK), jnp.float32),
        grid=(grid,),
        in_specs=[
            pl.BlockSpec((tbr, PACK * F), lambda i: (i, 0)),   # streamed batch tile
            pl.BlockSpec((PACK * F, PACK), lambda i: (0, 0)),  # VMEM-resident weight
            pl.BlockSpec((1, PACK), lambda i: (0, 0)),         # VMEM-resident bias
        ],
        out_specs=pl.BlockSpec((tbr, PACK), lambda i: (i, 0)),
        compiler_params=pltpu.CompilerParams(
            dimension_semantics=("parallel",)),
        cost_estimate=pl.CostEstimate(
            flops=2 * rows * (PACK * F) * PACK,
            transcendentals=0,
            bytes_accessed=bytes_accessed),
    )(x_r, w_block, b_row)

    # Undo packing / padding: o[r, i] is the output of batch row PACK*r + i.
    return out.reshape(-1)[:B].reshape(B, 1)


def init_params(key, input_size=15):
    # Deterministic init mimicking PyTorch Linear default (uniform +/- 1/sqrt(fan_in)).
    def linear(key, fan_in, fan_out):
        kw, kb = jax.random.split(key)
        bound = 1.0 / jnp.sqrt(float(fan_in))
        # stored as [in, out] (transposed vs. torch's [out, in]) for x @ W
        w = jax.random.uniform(kw, (fan_in, fan_out), jnp.float32, -bound, bound)
        b = jax.random.uniform(kb, (1, fan_out), jnp.float32, -bound, bound)
        return w, b

    k1, k2, k3 = jax.random.split(key, 3)
    w1, b1 = linear(k1, input_size, 6)
    w2, b2 = linear(k2, 6, 1)
    w3, b3 = linear(k3, 1, 1)
    return (w1, b1, w2, b2, w3, b3)


if __name__ == "__main__":
    key = jax.random.PRNGKey(0)
    kx, kp = jax.random.split(key)

    input_size = 15
    params = init_params(kp, input_size)
    w1, b1, w2, b2, w3, b3 = params

    # Small batch, a non-multiple-of-8 batch (exercises the tiny pad path), and a
    # batch that gives a ragged last grid block.
    for batch in (8, 13, 1000):
        x = jax.random.normal(jax.random.fold_in(kx, batch),
                              (batch, input_size), jnp.float32)
        out = regression_net(x, params)
        jax.block_until_ready(out)

        # Pure-JAX reference of the original (unfolded) 3-Linear forward pass.
        ref = ((x @ w1 + b1) @ w2 + b2) @ w3 + b3
        assert out.shape == (batch, 1)
        assert jnp.allclose(out, ref, atol=1e-5, rtol=1e-5), \
            float(jnp.max(jnp.abs(out - ref)))

    print("KERNEL_OK")
</pallas_src>

<mosaic_0001>
module attributes {stable_mosaic.version = 11 : i64} {
  func.func @regression_net_kernel(%arg0: i32, %arg1: memref<1x120xf32, #tpu.memory_space<vmem>>, %arg2: memref<120x8xf32, #tpu.memory_space<vmem>>, %arg3: memref<1x8xf32, #tpu.memory_space<vmem>>, %arg4: memref<1x8xf32, #tpu.memory_space<vmem>>) attributes {dimension_semantics = [#tpu.dimension_semantics<parallel>], iteration_bounds = array<i64: 1>, scalar_prefetch = 0 : i64, scratch_operands = 0 : i64, tpu.core_type = #tpu.core_type<tc>, window_params = [{transform_indices = @transform_0, window_bounds = array<i64: 1, 120>}, {pipeline_mode = #tpu.pipeline_mode<synchronous>, transform_indices = @transform_1, window_bounds = array<i64: 120, 8>}, {pipeline_mode = #tpu.pipeline_mode<synchronous>, transform_indices = @transform_2, window_bounds = array<i64: 1, 8>}, {transform_indices = @transform_3, window_bounds = array<i64: 1, 8>}]} {
    %c0 = arith.constant 0 : index
    %c0_0 = arith.constant 0 : index
    %0 = vector.load %arg1[%c0, %c0_0] : memref<1x120xf32, #tpu.memory_space<vmem>>, vector<1x120xf32>
    %c0_1 = arith.constant 0 : index
    %c0_2 = arith.constant 0 : index
    %1 = vector.load %arg2[%c0_1, %c0_2] : memref<120x8xf32, #tpu.memory_space<vmem>>, vector<120x8xf32>
    %cst = arith.constant dense<0.000000e+00> : vector<1x8xf32>
    %2 = tpu.matmul %0, %1, %cst {dimension_numbers = #tpu.dot_dimension_numbers<[1], [0], [0], [1], [0, 0, 1, 1], [], []>} : vector<1x120xf32>, vector<120x8xf32>, vector<1x8xf32> -> vector<1x8xf32>
    %c0_3 = arith.constant 0 : index
    %c0_4 = arith.constant 0 : index
    %3 = vector.load %arg3[%c0_3, %c0_4] : memref<1x8xf32, #tpu.memory_space<vmem>>, vector<1x8xf32>
    %4 = arith.addf %2, %3 : vector<1x8xf32>
    %c0_5 = arith.constant 0 : index
    %c0_6 = arith.constant 0 : index
    %5 = vector.load %arg4[%c0_5, %c0_6] : memref<1x8xf32, #tpu.memory_space<vmem>>, vector<1x8xf32>
    tpu.vector_store %arg4[%c0_5, %c0_6], %4 {strides = array<i32>} : memref<1x8xf32, #tpu.memory_space<vmem>>, vector<1x8xf32>,
    return
  }
  func.func @transform_0(%arg0: i32) -> (i32, i32) {
    %c0_i32 = arith.constant 0 : i32
    %c0_i32_0 = arith.constant 0 : i32
    return %arg0, %c0_i32 : i32, i32
  }
  func.func @transform_1(%arg0: i32) -> (i32, i32) {
    %c0_i32 = arith.constant 0 : i32
    %c0_i32_0 = arith.constant 0 : i32
    %c0_i32_1 = arith.constant 0 : i32
    return %c0_i32, %c0_i32_0 : i32, i32
  }
  func.func @transform_2(%arg0: i32) -> (i32, i32) {
    %c0_i32 = arith.constant 0 : i32
    %c0_i32_0 = arith.constant 0 : i32
    %c0_i32_1 = arith.constant 0 : i32
    return %c0_i32, %c0_i32_0 : i32, i32
  }
  func.func @transform_3(%arg0: i32) -> (i32, i32) {
    %c0_i32 = arith.constant 0 : i32
    %c0_i32_0 = arith.constant 0 : i32
    return %arg0, %c0_i32 : i32, i32
  }
}

</mosaic_0001>

<bundles_post_ra>
// kernel: regression_net.1
= control target key start
LH: loop header
LB: loop body
LE: loop exit
PB: predicated region body
PF: predicated region fallthrough
CT: control target
= control target key end

     0   :  { %v221_v3 = vmov 0.0|0.0   ;;  %vm222_vm0 = vmmov 0   ;;  %v223_v6 = vmov 0.0   ;;  %s308_s0 = inlined_call_operand.vmem [shape: f32[1,120], index: 0, kind: input, shape index: {}]   ;;  %s309_s1 = inlined_call_operand.vmem [shape: f32[120,8], index: 1, kind: input, shape index: {}]   ;;  %s310_s2 = inlined_call_operand.vmem [shape: f32[1,8], index: 2, kind: input, shape index: {}]   ;;  %s311_s3 = inlined_call_operand.hbm [shape: f32[1,8], index: 3, kind: output, shape index: {}]  }
   0x1   :  { %v16_v0 = vld [vmem:[%s309_s1] sm:$0xff]  ;;  %v17_v1 = vld [vmem:[%s309_s1 + $0x8] sm:$0xff]  ;;  %v18_v2 = vld [vmem:[%s309_s1 + $0x10] sm:$0xff]  ;;  %172 = vmatprep.subr.bf16.mxu0 %v221_v3  ;;  %169 = vmatprep.mubr.msk.f32.mxu0 %vm222_vm0, %v223_v6 }
   0x2   :  { %v173_v4 = vpack.c.bf16 %v17_v1, %v16_v0  ;;  %v19_v5 = vld [vmem:[%s309_s1 + $0x18] sm:$0xff]  ;;  %v20_v8 = vld [vmem:[%s309_s1 + $0x20] sm:$0xff]  ;;  %v21_v9 = vld [vmem:[%s309_s1 + $0x28] sm:$0xff] }
   0x3   :  { %v176_v7 = vpack.c.bf16 %v19_v5, %v18_v2 }
   0x4   :  { %174 = vmatpush3.bf16.msra.mxu0 %v173_v4 }
   0x5   :  { %175 = vmatprep.subr.bf16.mxu0 %v221_v3 }
   0x6   :  { %8 = vsyncpa [#allocation3], 0  ;;  %v179_v10 = vpack.c.bf16 %v21_v9, %v20_v8  ;;  %v22_v11 = vld [vmem:[%s309_s1 + $0x30] sm:$0xff]  ;;  %v23_v12 = vld [vmem:[%s309_s1 + $0x38] sm:$0xff]  ;;  %vm32_vm1 = vcmask 982016   ;;  %s224_s19 = smov [#allocation2]  }
   0x7   :  { %v182_v13 = vpack.c.bf16 %v23_v12, %v22_v11  ;;  %v24_v14 = vld [vmem:[%s309_s1 + $0x40] sm:$0xff]  ;;  %v25_v15 = vld [vmem:[%s309_s1 + $0x48] sm:$0xff]  ;;  %v26_v17 = vld [vmem:[%s309_s1 + $0x50] sm:$0xff]  ;;  %s114_s20 = sshll.u32 %s224_s19, 4  ;;  %vm106_vm2 = vcmask 57344   ;;  %s115_s20 = int_to_ptr.vmem [resolvable:$true] %s114_s20 }
   0x8   :  { %177 = vmatpush3.bf16.msra.mxu0 %v176_v7  ;;  %v185_v16 = vpack.c.bf16 %v25_v15, %v24_v14  ;;  %v27_v18 = vld [vmem:[%s309_s1 + $0x58] sm:$0xff]  ;;  %v28_v20 = vld [vmem:[%s309_s1 + $0x60] sm:$0xff]  ;;  %v29_v21 = vld [vmem:[%s309_s1 + $0x68] sm:$0xff]  ;;  %s201_s21 = scalar_lea.vmem %s115_s20, 32  ;;  %p202_p1 = scmp.lt.s32.totalorder %s115_s20, %s115_s20 }
   0x9   :  { %178 = vmatprep.subr.bf16.mxu0 %v221_v3  ;;  %v188_v19 = vpack.c.bf16 %v27_v18, %v26_v17  ;;  %v191_v22 = vpack.c.bf16 %v29_v21, %v28_v20  ;;  %v30_v23 = vld [vmem:[%s309_s1 + $0x70] sm:$0xff]  ;;  %v15_v24 = vld [vmem:[%s308_s0] sm:$0x1]  ;;  %s197_s1 = scalar_lea.vmem %s115_s20, 16 }
   0xa   :  { %v31_v25 = vld [vmem:[%s310_s2] sm:$0x1]  ;;  %p198_p0 = scmp.ne.s32.totalorder %s115_s20, %s197_s1  ;;  %p203_p2 = scmp.lt.s32.totalorder %s201_s21, %s197_s1 }
   0xc   :  { %180 = vmatpush3.bf16.msra.mxu0 %v179_v10  ;;  %p204_p3 = por %p203_p2, %p202_p1 }
   0xd   :  { %181 = vmatprep.subr.bf16.mxu0 %v221_v3 }
   0xe   :  { %p205_p4 = pnand %p204_p3, %p198_p0 }
  0x10   :  { %183 = vmatpush3.bf16.msra.mxu0 %v182_v13 }
  0x11   :  { %184 = vmatprep.subr.bf16.mxu0 %v221_v3 }
  0x14   :  { %186 = vmatpush3.bf16.msra.mxu0 %v185_v16 }
  0x15   :  { %187 = vmatprep.subr.bf16.mxu0 %v221_v3 }
  0x18   :  { %189 = vmatpush3.bf16.msra.mxu0 %v188_v19 }
  0x19   :  { %190 = vmatprep.subr.bf16.mxu0 %v221_v3 }
  0x1c   :  { %192 = vmatpush3.bf16.msra.mxu0 %v191_v22 }
  0x1d   :  { %167 = vmatprep.subr.mxu0 %v223_v6 }
  0x20   :  { %168 = vmatpush3.msra.mxu0 %v30_v23 }
  0x21   :  { %170 = vmatmul.mubr.msk.f32.vlgmr.msra.gmra.mrb[0].mxu0 %vm32_vm1, %v15_v24 }
  0xf4   :  { %v102_v26 = vpop.f32.mrb[0].mxu0 }
  0xf5   :  { %v103_v27 = vadd.f32 %v102_v26, %v31_v25  ;;  %v171_v28 = vpop.f32.mrb[1].mxu0 }
  0xf7   :  { %107 = vst.msk [vmem:[#allocation2] sm:$0x1] %vm106_vm2, %v103_v27 }
  0xf8   :  { %208 = shalt.err (!%p205_p4)
}
  0xf9   :  { %s209_s2 = scalar_lea.hbm %s311_s3, 16 }
  0xfa   :  { %p210_p5 = scmp.ne.s32.totalorder %s311_s3, %s209_s2  ;;  %p213_p6 = scmp.lt.u32.totalorder %s209_s2, %s311_s3 }
  0xfc   :  { %p215_p7 = pnand %p213_p6, %p210_p5 }
  0xfe   :  { %218 = shalt.err (!%p215_p7)
}
  0xff   :  { %117 = dma.vmem_to_hbm [thread:$0]  %s115_s20, 16, %s311_s3, [#allocation3]  }
 0x100   :  { %219 = dma.done.wait [#allocation3], 16  }
 0x101   :  { %220 = vsyncadd [#allocation3], 4294967280 }
 0x102   :  { %121 = vsyncpa [#allocation3], 1 }

</bundles_post_ra>
